<compile_context>
chip_gen: v7x
topology: tpu7x:2x2x1
jax: 0.10.0
libtpu: 0.0.40
codegen_flags: <defaults>
</compile_context>

<pallas_src>
import functools

import jax
import jax.numpy as jnp
from jax import lax
from jax.experimental import pallas as pl
from jax.experimental.pallas import tpu as pltpu


def classifier_head_kernel(scal_ref, w1_ref, taps_ref, sub_ref, o_ref,
                           sum_ref, sq_ref, *, inv_count):
    """One grid step over a lane tile of the conv1 output.

    scal_ref : SMEM (3,)   f32  [gamma, beta, w2]
    w1_ref   : VMEM (C*9, 1)    flattened conv1 weight, (c, ki, kj) order
    taps_ref : VMEM (C*9, TS)   streamed tap-slab tile (zero-padded past S)
    sub_ref  : VMEM (C*9, NSUB) taps at the output positions (n, 4a, 4b)
    o_ref    : VMEM (1, NSUB)   output row
    sum_ref / sq_ref : VMEM (1,1) f32 running sum / sum-of-squares of conv1(x)
    """
    step = pl.program_id(0)

    @pl.when(step == 0)
    def _init():
        sum_ref[...] = jnp.zeros_like(sum_ref)
        sq_ref[...] = jnp.zeros_like(sq_ref)

    # conv1 on this tile: M=1 contraction -> VPU broadcast-multiply + sublane
    # reduce over the C*9 taps (no MXU).
    y = jnp.sum(taps_ref[...] * w1_ref[...], axis=0, keepdims=True)   # (1, TS)

    # Single-pass BatchNorm statistics (padding columns are zero -> harmless).
    sum_ref[...] += jnp.sum(y, keepdims=True)
    sq_ref[...] += jnp.sum(y * y, keepdims=True)

    @pl.when(step == pl.num_programs(0) - 1)
    def _finalize():
        mean = sum_ref[...] * inv_count                        # (1, 1)
        var = sq_ref[...] * inv_count - mean * mean            # biased (training) var
        inv = lax.rsqrt(var + 1e-5)
        gamma = scal_ref[0]
        beta = scal_ref[1]
        w2 = scal_ref[2]
        # The two stride-2 1x1 convs compose to a stride-4 subsample of y;
        # only the NSUB needed conv1 outputs are computed here (tiny).
        ysub = jnp.sum(sub_ref[...] * w1_ref[...], axis=0, keepdims=True)
        ysub = jnp.maximum((ysub - mean) * inv * gamma + beta, 0.0)
        o_ref[...] = w2 * jax.nn.sigmoid(w2 * ysub)


def classifier_head_forward(x, params, *, tile_lanes=4096):
    w1, gamma, beta, w2 = params
    n, c, h, w = x.shape
    c1 = w1.shape[0]
    assert c1 == 1, "forward applies conv2 twice -> requires num_channels // 4 == 1"

    KH = KW = 3
    STRIDE, PAD = 4, 2
    OH = (h + 2 * PAD - KH) // STRIDE + 1
    OW = (w + 2 * PAD - KW) // STRIDE + 1
    oh2, ow2 = (OH - 1) // 2 + 1, (OW - 1) // 2 + 1
    oh3, ow3 = (oh2 - 1) // 2 + 1, (ow2 - 1) // 2 + 1

    # "Free" im2col: kernel (3) < stride (4) => taps never overlap, so the
    # patch slab is zero-pad + reshape + transpose of x (no duplication).
    Eh, Ew = STRIDE * OH, STRIDE * OW
    xf = x.astype(jnp.float32)
    xp = jnp.pad(xf, ((0, 0), (0, 0),
                      (PAD, Eh - PAD - h), (PAD, Ew - PAD - w)))
    x6 = xp.reshape(n, c, OH, STRIDE, OW, STRIDE)
    t6 = x6.transpose(1, 3, 5, 0, 2, 4)[:, :KH, :KW]           # (C,3,3,N,OH,OW)

    CK = c * KH * KW
    S = n * OH * OW
    taps = t6.reshape(CK, S)

    # Only y[n, 4a, 4b] feed the output (the two stride-2 convs compose).
    tsub = t6[:, :, :, :, ::4, ::4].reshape(CK, n * oh3 * ow3)
    NSUB = n * oh3 * ow3

    # Lane-tiled grid over the spatial axis; last tile zero-padded (zeros do
    # not perturb sum/sumsq; the true count S is used for the divisors).
    LANE = 128
    TS = min(int(tile_lanes), ((S + LANE - 1) // LANE) * LANE)
    TS = ((TS + LANE - 1) // LANE) * LANE
    S_pad = ((S + TS - 1) // TS) * TS
    taps_p = jnp.pad(taps, ((0, 0), (0, S_pad - S)))
    n_tiles = S_pad // TS

    w1_col = w1.reshape(CK, 1).astype(jnp.float32)              # (c, ki, kj) order
    scalars = jnp.stack([gamma.reshape(()), beta.reshape(()),
                         w2.reshape(())]).astype(jnp.float32)   # (3,) -> SMEM

    out = pl.pallas_call(
        functools.partial(classifier_head_kernel, inv_count=1.0 / S),
        out_shape=jax.ShapeDtypeStruct((1, NSUB), jnp.float32),
        grid=(n_tiles,),
        in_specs=[
            pl.BlockSpec(memory_space=pltpu.MemorySpace.SMEM),   # gamma/beta/w2
            pl.BlockSpec((CK, 1), lambda i: (0, 0)),             # w1 (resident)
            pl.BlockSpec((CK, TS), lambda i: (0, i)),            # streamed taps
            pl.BlockSpec((CK, NSUB), lambda i: (0, 0)),          # output-col taps
        ],
        out_specs=pl.BlockSpec((1, NSUB), lambda i: (0, 0)),
        scratch_shapes=[pltpu.VMEM((1, 1), jnp.float32),         # sum
                        pltpu.VMEM((1, 1), jnp.float32)],        # sum of squares
        compiler_params=pltpu.CompilerParams(
            dimension_semantics=("arbitrary",)),                 # BN reduction axis
    )(scalars, w1_col, taps_p, tsub)

    return out.reshape(n, 1, oh3, ow3)                           # NCHW


def ref_forward(x, w1, gamma, beta, w2):
    """Pure-JAX reference mirroring the PyTorch forward (training-mode BN)."""
    dn = ('NCHW', 'OIHW', 'NCHW')
    y = lax.conv_general_dilated(x, w1, (4, 4), ((2, 2), (2, 2)),
                                 dimension_numbers=dn)
    mean = jnp.mean(y, axis=(0, 2, 3), keepdims=True)
    var = jnp.mean((y - mean) ** 2, axis=(0, 2, 3), keepdims=True)
    y = (y - mean) / jnp.sqrt(var + 1e-5)
    y = y * gamma.reshape(1, -1, 1, 1) + beta.reshape(1, -1, 1, 1)
    y = jnp.maximum(y, 0.0)
    z = lax.conv_general_dilated(y, w2, (2, 2), 'VALID', dimension_numbers=dn)
    z = jax.nn.sigmoid(z)
    return lax.conv_general_dilated(z, w2, (2, 2), 'VALID', dimension_numbers=dn)


if __name__ == "__main__":
    num_channels = 4          # forward only type-checks when num_channels // 4 == 1
    c1 = num_channels // 4    # = 1

    key = jax.random.PRNGKey(0)
    kx, k1, k2, k3, k4, kx2 = jax.random.split(key, 6)

    fan_in1 = num_channels * 3 * 3
    w1 = jax.random.uniform(k1, (c1, num_channels, 3, 3), jnp.float32,
                            -1.0 / fan_in1 ** 0.5, 1.0 / fan_in1 ** 0.5)
    gamma = 1.0 + 0.5 * jax.random.uniform(k3, (c1,), jnp.float32)
    beta = 0.2 * jax.random.normal(k4, (c1,), jnp.float32)
    w2 = jax.random.uniform(k2, (1, c1, 1, 1), jnp.float32,
                            -1.0 / c1 ** 0.5, 1.0 / c1 ** 0.5)
    params = (w1, gamma, beta, w2)

    # Primary check: the spec's small shape (N=2, C=4, 16x16) -> (2,1,2,2).
    x = jax.random.normal(kx, (2, num_channels, 16, 16), jnp.float32)
    out = jax.block_until_ready(classifier_head_forward(x, params))
    ref = ref_forward(x, w1, gamma, beta, w2)
    assert out.shape == ref.shape == (2, 1, 2, 2), (out.shape, ref.shape)
    err = float(jnp.max(jnp.abs(out - ref)))
    assert err < 1e-4, f"max abs err {err}"

    # Secondary check: small tiles force several grid steps so the cross-tile
    # BN sum/sumsq accumulation path is actually exercised.
    x2 = jax.random.normal(kx2, (2, num_channels, 64, 64), jnp.float32)
    out2 = jax.block_until_ready(
        classifier_head_forward(x2, params, tile_lanes=128))
    ref2 = ref_forward(x2, w1, gamma, beta, w2)
    assert out2.shape == ref2.shape == (2, 1, 5, 5), (out2.shape, ref2.shape)
    err2 = float(jnp.max(jnp.abs(out2 - ref2)))
    assert err2 < 1e-4, f"max abs err (tiled) {err2}"

    print("KERNEL_OK")
</pallas_src>

<mosaic_0001>
module attributes {stable_mosaic.version = 11 : i64} {
  func.func @classifier_head_kernel(%arg0: i32, %arg1: memref<3xf32, #tpu.memory_space<smem>>, %arg2: memref<36x1xf32, #tpu.memory_space<vmem>>, %arg3: memref<36x128xf32, #tpu.memory_space<vmem>>, %arg4: memref<36x8xf32, #tpu.memory_space<vmem>>, %arg5: memref<1x8xf32, #tpu.memory_space<vmem>>, %arg6: memref<1x1xf32, #tpu.memory_space<vmem>>, %arg7: memref<1x1xf32, #tpu.memory_space<vmem>>) attributes {dimension_semantics = [#tpu.dimension_semantics<arbitrary>], iteration_bounds = array<i64: 1>, scalar_prefetch = 0 : i64, scratch_operands = 2 : i64, tpu.core_type = #tpu.core_type<tc>, window_params = [{transform_indices = @transform_0, window_bounds = array<i64: 3>}, {pipeline_mode = #tpu.pipeline_mode<synchronous>, transform_indices = @transform_1, window_bounds = array<i64: 36, 1>}, {transform_indices = @transform_2, window_bounds = array<i64: 36, 128>}, {pipeline_mode = #tpu.pipeline_mode<synchronous>, transform_indices = @transform_3, window_bounds = array<i64: 36, 8>}, {pipeline_mode = #tpu.pipeline_mode<synchronous>, transform_indices = @transform_4, window_bounds = array<i64: 1, 8>}]} {
    %c0_i32 = arith.constant 0 : i32
    %0 = arith.cmpi eq, %arg0, %c0_i32 : i32
    %1 = arith.extui %0 : i1 to i32
    %c0_i32_0 = arith.constant 0 : i32
    %2 = arith.cmpi ne, %1, %c0_i32_0 : i32
    scf.if %2 {
      %cst_16 = arith.constant 0.000000e+00 : f32
      %29 = vector.broadcast %cst_16 : f32 to vector<1x1xf32>
      %c0_17 = arith.constant 0 : index
      %c0_18 = arith.constant 0 : index
      %30 = vector.load %arg6[%c0_17, %c0_18] : memref<1x1xf32, #tpu.memory_space<vmem>>, vector<1x1xf32>
      tpu.vector_store %arg6[%c0_17, %c0_18], %29 {strides = array<i32>} : memref<1x1xf32, #tpu.memory_space<vmem>>, vector<1x1xf32>,
      %cst_19 = arith.constant 0.000000e+00 : f32
      %31 = vector.broadcast %cst_19 : f32 to vector<1x1xf32>
      %c0_20 = arith.constant 0 : index
      %c0_21 = arith.constant 0 : index
      %32 = vector.load %arg7[%c0_20, %c0_21] : memref<1x1xf32, #tpu.memory_space<vmem>>, vector<1x1xf32>
      tpu.vector_store %arg7[%c0_20, %c0_21], %31 {strides = array<i32>} : memref<1x1xf32, #tpu.memory_space<vmem>>, vector<1x1xf32>,
    } else {
    }
    %c0 = arith.constant 0 : index
    %c0_1 = arith.constant 0 : index
    %3 = vector.load %arg3[%c0, %c0_1] : memref<36x128xf32, #tpu.memory_space<vmem>>, vector<36x128xf32>
    %c0_2 = arith.constant 0 : index
    %c0_3 = arith.constant 0 : index
    %4 = vector.load %arg2[%c0_2, %c0_3] : memref<36x1xf32, #tpu.memory_space<vmem>>, vector<36x1xf32>
    %5 = vector.broadcast %4 : vector<36x1xf32> to vector<36x128xf32>
    %6 = arith.mulf %3, %5 : vector<36x128xf32>
    %cst = arith.constant dense<0.000000e+00> : vector<128xf32>
    %7 = vector.multi_reduction <add>, %6, %cst [0] : vector<36x128xf32> to vector<128xf32>
    %8 = vector.shape_cast %7 : vector<128xf32> to vector<1x128xf32>
    %c0_4 = arith.constant 0 : index
    %c0_5 = arith.constant 0 : index
    %9 = vector.load %arg6[%c0_4, %c0_5] : memref<1x1xf32, #tpu.memory_space<vmem>>, vector<1x1xf32>
    %10 = vector.shape_cast %8 : vector<1x128xf32> to vector<1x1x128xf32>
    %cst_6 = arith.constant dense<0.000000e+00> : vector<1xf32>
    %11 = vector.multi_reduction <add>, %10, %cst_6 [1, 2] : vector<1x1x128xf32> to vector<1xf32>
    %12 = vector.shape_cast %11 : vector<1xf32> to vector<1x1x1xf32>
    %13 = vector.extract %12[0, 0, 0] : f32 from vector<1x1x1xf32>
    %14 = vector.broadcast %13 : f32 to vector<1x1xf32>
    %15 = arith.addf %9, %14 : vector<1x1xf32>
    %c0_7 = arith.constant 0 : index
    %c0_8 = arith.constant 0 : index
    %16 = vector.load %arg6[%c0_7, %c0_8] : memref<1x1xf32, #tpu.memory_space<vmem>>, vector<1x1xf32>
    tpu.vector_store %arg6[%c0_7, %c0_8], %15 {strides = array<i32>} : memref<1x1xf32, #tpu.memory_space<vmem>>, vector<1x1xf32>,
    %c0_9 = arith.constant 0 : index
    %c0_10 = arith.constant 0 : index
    %17 = vector.load %arg7[%c0_9, %c0_10] : memref<1x1xf32, #tpu.memory_space<vmem>>, vector<1x1xf32>
    %18 = arith.mulf %8, %8 : vector<1x128xf32>
    %19 = vector.shape_cast %18 : vector<1x128xf32> to vector<1x1x128xf32>
    %cst_11 = arith.constant dense<0.000000e+00> : vector<1xf32>
    %20 = vector.multi_reduction <add>, %19, %cst_11 [1, 2] : vector<1x1x128xf32> to vector<1xf32>
    %21 = vector.shape_cast %20 : vector<1xf32> to vector<1x1x1xf32>
    %22 = vector.extract %21[0, 0, 0] : f32 from vector<1x1x1xf32>
    %23 = vector.broadcast %22 : f32 to vector<1x1xf32>
    %24 = arith.addf %17, %23 : vector<1x1xf32>
    %c0_12 = arith.constant 0 : index
    %c0_13 = arith.constant 0 : index
    %25 = vector.load %arg7[%c0_12, %c0_13] : memref<1x1xf32, #tpu.memory_space<vmem>>, vector<1x1xf32>
    tpu.vector_store %arg7[%c0_12, %c0_13], %24 {strides = array<i32>} : memref<1x1xf32, #tpu.memory_space<vmem>>, vector<1x1xf32>,
    %c0_i32_14 = arith.constant 0 : i32
    %26 = arith.cmpi eq, %arg0, %c0_i32_14 : i32
    %27 = arith.extui %26 : i1 to i32
    %c0_i32_15 = arith.constant 0 : i32
    %28 = arith.cmpi ne, %27, %c0_i32_15 : i32
    scf.if %28 {
      %c0_16 = arith.constant 0 : index
      %c0_17 = arith.constant 0 : index
      %29 = vector.load %arg6[%c0_16, %c0_17] : memref<1x1xf32, #tpu.memory_space<vmem>>, vector<1x1xf32>
      %cst_18 = arith.constant 2.000000e-02 : f32
      %30 = vector.broadcast %cst_18 : f32 to vector<1x1xf32>
      %31 = arith.mulf %29, %30 : vector<1x1xf32>
      %c0_19 = arith.constant 0 : index
      %c0_20 = arith.constant 0 : index
      %32 = vector.load %arg7[%c0_19, %c0_20] : memref<1x1xf32, #tpu.memory_space<vmem>>, vector<1x1xf32>
      %cst_21 = arith.constant 2.000000e-02 : f32
      %33 = vector.broadcast %cst_21 : f32 to vector<1x1xf32>
      %34 = arith.mulf %32, %33 : vector<1x1xf32>
      %35 = arith.mulf %31, %31 : vector<1x1xf32>
      %36 = arith.subf %34, %35 : vector<1x1xf32>
      %cst_22 = arith.constant 9.99999974E-6 : f32
      %37 = vector.broadcast %cst_22 : f32 to vector<1x1xf32>
      %38 = arith.addf %36, %37 : vector<1x1xf32>
      %39 = math.rsqrt %38 : vector<1x1xf32>
      %c0_23 = arith.constant 0 : index
      %40 = memref.load %arg1[%c0_23] : memref<3xf32, #tpu.memory_space<smem>>
      %c1 = arith.constant 1 : index
      %41 = memref.load %arg1[%c1] : memref<3xf32, #tpu.memory_space<smem>>
      %c2 = arith.constant 2 : index
      %42 = memref.load %arg1[%c2] : memref<3xf32, #tpu.memory_space<smem>>
      %c0_24 = arith.constant 0 : index
      %c0_25 = arith.constant 0 : index
      %43 = vector.load %arg4[%c0_24, %c0_25] : memref<36x8xf32, #tpu.memory_space<vmem>>, vector<36x8xf32>
      %c0_26 = arith.constant 0 : index
      %c0_27 = arith.constant 0 : index
      %44 = vector.load %arg2[%c0_26, %c0_27] : memref<36x1xf32, #tpu.memory_space<vmem>>, vector<36x1xf32>
      %45 = vector.broadcast %44 : vector<36x1xf32> to vector<36x8xf32>
      %46 = arith.mulf %43, %45 : vector<36x8xf32>
      %cst_28 = arith.constant dense<0.000000e+00> : vector<8xf32>
      %47 = vector.multi_reduction <add>, %46, %cst_28 [0] : vector<36x8xf32> to vector<8xf32>
      %48 = vector.shape_cast %47 : vector<8xf32> to vector<1x8xf32>
      %49 = vector.broadcast %31 : vector<1x1xf32> to vector<1x8xf32>
      %50 = arith.subf %48, %49 : vector<1x8xf32>
      %51 = vector.broadcast %39 : vector<1x1xf32> to vector<1x8xf32>
      %52 = arith.mulf %50, %51 : vector<1x8xf32>
      %53 = vector.broadcast %40 : f32 to vector<1x8xf32>
      %54 = arith.mulf %52, %53 : vector<1x8xf32>
      %55 = vector.broadcast %41 : f32 to vector<1x8xf32>
      %56 = arith.addf %54, %55 : vector<1x8xf32>
      %cst_29 = arith.constant 0.000000e+00 : f32
      %57 = vector.broadcast %cst_29 : f32 to vector<1x8xf32>
      %58 = arith.maximumf %56, %57 : vector<1x8xf32>
      %59 = vector.broadcast %42 : f32 to vector<1x8xf32>
      %60 = arith.mulf %59, %58 : vector<1x8xf32>
      %61 = arith.negf %60 : vector<1x8xf32>
      %62 = math.exp %61 : vector<1x8xf32>
      %cst_30 = arith.constant 1.000000e+00 : f32
      %63 = vector.broadcast %cst_30 : f32 to vector<1x8xf32>
      %64 = arith.addf %63, %62 : vector<1x8xf32>
      %65 = arith.divf %63, %64 : vector<1x8xf32>
      %66 = vector.broadcast %42 : f32 to vector<1x8xf32>
      %67 = arith.mulf %66, %65 : vector<1x8xf32>
      %c0_31 = arith.constant 0 : index
      %c0_32 = arith.constant 0 : index
      %68 = vector.load %arg5[%c0_31, %c0_32] : memref<1x8xf32, #tpu.memory_space<vmem>>, vector<1x8xf32>
      tpu.vector_store %arg5[%c0_31, %c0_32], %67 {strides = array<i32>} : memref<1x8xf32, #tpu.memory_space<vmem>>, vector<1x8xf32>,
    } else {
    }
    return
  }
  func.func @transform_0(%arg0: i32) -> i32 {
    %c0_i32 = arith.constant 0 : i32
    %c0_i32_0 = arith.constant 0 : i32
    return %c0_i32 : i32
  }
  func.func @transform_1(%arg0: i32) -> (i32, i32) {
    %c0_i32 = arith.constant 0 : i32
    %c0_i32_0 = arith.constant 0 : i32
    %c0_i32_1 = arith.constant 0 : i32
    return %c0_i32, %c0_i32_0 : i32, i32
  }
  func.func @transform_2(%arg0: i32) -> (i32, i32) {
    %c0_i32 = arith.constant 0 : i32
    %c0_i32_0 = arith.constant 0 : i32
    return %c0_i32, %arg0 : i32, i32
  }
  func.func @transform_3(%arg0: i32) -> (i32, i32) {
    %c0_i32 = arith.constant 0 : i32
    %c0_i32_0 = arith.constant 0 : i32
    %c0_i32_1 = arith.constant 0 : i32
    return %c0_i32, %c0_i32_0 : i32, i32
  }
  func.func @transform_4(%arg0: i32) -> (i32, i32) {
    %c0_i32 = arith.constant 0 : i32
    %c0_i32_0 = arith.constant 0 : i32
    %c0_i32_1 = arith.constant 0 : i32
    return %c0_i32, %c0_i32_0 : i32, i32
  }
}

</mosaic_0001>

<bundles_post_ra>
// kernel: tpu_custom_call.1
= control target key start
LH: loop header
LB: loop body
LE: loop exit
PB: predicated region body
PF: predicated region fallthrough
CT: control target
= control target key end

     0   :  { %9 = vsyncpa [#allocation6], 0  ;;  %s396_s0 = inlined_call_operand.vmem [shape: f32[3], index: 0, kind: input, shape index: {}]   ;;  %s397_s1 = inlined_call_operand.vmem [shape: f32[36,1], index: 1, kind: input, shape index: {}]   ;;  %s398_s2 = inlined_call_operand.vmem [shape: f32[36,128], index: 2, kind: input, shape index: {}]   ;;  %s399_s3 = inlined_call_operand.vmem [shape: f32[36,8], index: 3, kind: input, shape index: {}]   ;;  %s400_s4 = inlined_call_operand.hbm [shape: f32[1,8], index: 4, kind: output, shape index: {}]  }
   0x1   :  { %10 = vsyncpa [#allocation5], 0  ;;  %s17_s17 = sshll.u32 %s396_s0, 4  ;;  %s18_s17 = int_to_ptr.vmem [resolvable:$true] %s17_s17 }
   0x2   :  { %s262_s18 = scalar_lea.vmem %s18_s17, 16  ;;  %p267_p1 = scmp.lt.s32.totalorder %s18_s17, %s18_s17 }
   0x3   :  { %p263_p0 = scmp.ne.s32.totalorder %s18_s17, %s262_s18  ;;  %p268_p2 = scmp.lt.s32.totalorder %s262_s18, %s262_s18 }
   0x5   :  { %p269_p3 = por %p268_p2, %p267_p1 }
   0x7   :  { %p270_p4 = pnand %p269_p3, %p263_p0 }
   0x9   :  { %273 = shalt.err (!%p270_p4)
}
   0xa   :  { %s300_s19 = smov [#allocation4]  }
   0xb   :  { %20 = dma.vmem_to_smem %s18_s17, 16, %s300_s19, [#allocation6]  }
   0xc   :  { %296 = dma.done.wait [#allocation6], 16  }
   0xd   :  { %297 = vsyncadd [#allocation6], 4294967280 }
   0xe   :  { %30 = sfence }
   0xf   :  { %v45_v0 = vld [vmem:[%s397_s1 + $0x10] sm:$0xff]  ;;  %v43_v1 = vld [vmem:[%s397_s1] sm:$0xff]  ;;  %v301_v2 = vmov 0   ;;  %v46_v3 = vld [vmem:[%s397_s1 + $0x18] sm:$0xff]  ;;  %vm81_vm0 = vcmask 1043456   ;;  %vm91_vm1 = vcmask 1040384  }
  0x10   :  { %255 = vset.pattern.permute.xlu1 %v301_v2  ;;  %254 = vset.pattern.permute.xlu0 %v301_v2  ;;  %v44_v4 = vld [vmem:[%s397_s1 + $0x8] sm:$0xff]  ;;  %v47_v5 = vld [vmem:[%s397_s1 + $0x20] sm:$0xf]  ;;  %v40_v10 = vld [vmem:[%s398_s2 + $0x10] sm:$0xff]  ;;  %vm35_vm2 = vcmask 0   ;;  %v302_v36 = vmov 0.0  }
  0x11   :  { %60 = vperm.xlu1 %255, %v45_v0   ;;  %50 = vperm.xlu0 %254, %v43_v1   ;;  %v38_v8 = vld [vmem:[%s398_s2] sm:$0xff]  ;;  %v39_v9 = vld [vmem:[%s398_s2 + $0x8] sm:$0xff]  ;;  %v41_v15 = vld [vmem:[%s398_s2 + $0x18] sm:$0xff]  ;;  %36 = vst.msk [vmem:[#allocation2] sm:$0x1] %vm35_vm2, %v302_v36  ;;  %vm175_vm3 = vcmask 64512  }
  0x12   :  { %v42_v16 = vld [vmem:[%s398_s2 + $0x20] sm:$0xf]  ;;  %37 = vst.msk [vmem:[#allocation3] sm:$0x1] %vm35_vm2, %v302_v36  ;;  %vm183_vm4 = vcmask 60416   ;;  %s132_s24 = sld [smem:[#allocation4]] }
  0x13   :  { %v144_v35 = vld [vmem:[%s397_s1 + $0x20] sm:$0xf]  ;;  %s243_s25 = sld [smem:[#allocation4 + $0x1]]  ;;  %s303_s26 = smov [#allocation7]   ;;  %vm226_vm5 = vcmask 57344  }
  0x14   :  { %v135_v2 = vld [vmem:[%s399_s3] sm:$0xff]  ;;  %s234_s27 = sshll.u32 %s303_s26, 4  ;;  %s235_s27 = int_to_ptr.vmem [resolvable:$true] %s234_s27 }
  0x15   :  { %65 = vperm.xlu1 %255, %v46_v3   ;;  %55 = vperm.xlu0 %254, %v44_v4   ;;  %s274_s28 = scalar_lea.vmem %s235_s27, 16  ;;  %s278_s29 = scalar_lea.vmem %s235_s27, 32 }
  0x16   :  { %p275_p5 = scmp.ne.s32.totalorder %s235_s27, %s274_s28  ;;  %p279_p6 = scmp.lt.s32.totalorder %s235_s27, %s235_s27 }
  0x17   :  { %p280_p7 = scmp.lt.s32.totalorder %s278_s29, %s274_s28 }
  0x18   :  { %v90_v51 = vld [vmem:[#allocation2] sm:$0x1] }
  0x19   :  { %70 = vperm.xlu0 %254, %v47_v5   ;;  %v106_v53 = vld [vmem:[#allocation3] sm:$0x1]  ;;  %p281_p8 = por %p280_p7, %p279_p6 }
  0x1b   :  { %p282_p9 = pnand %p281_p8, %p275_p5 }
  0x90   :  { %v61_v6 = vpop.permute.xlu1 %60  ;;  %v51_v7 = vpop.permute.xlu0 %50 }
  0x91   :  { %v73_v12 = vmul.f32 %v51_v7, %v38_v8  ;;  %v75_v17 = vmul.f32 %v61_v6, %v40_v10  ;;  %v137_v7 = vld [vmem:[%s399_s3 + $0x10] sm:$0xff]  ;;  %v138_v10 = vld [vmem:[%s399_s3 + $0x18] sm:$0xff] }
  0x94   :  { %v56_v11 = vpop.permute.xlu0 %55  ;;  %v66_v14 = vpop.permute.xlu1 %65 }
  0x95   :  { %v74_v13 = vmul.f32 %v56_v11, %v39_v9  ;;  %v76_v20 = vmul.f32 %v66_v14, %v41_v15 }
  0x97   :  { %v78_v18 = vadd.f32 %v74_v13, %v73_v12 }
  0x98   :  { %v71_v19 = vpop.permute.xlu0 %70 }
  0x99   :  { %v79_v21 = vadd.f32 %v78_v18, %v75_v17  ;;  %v77_v22 = vmul.f32 %v71_v19, %v42_v16  ;;  %v139_v17 = vld [vmem:[%s399_s3 + $0x20] sm:$0xf] }
  0x9b   :  { %v80_v23 = vadd.f32 %v79_v21, %v76_v20  ;;  %v82_v24 = vsel %vm81_vm0, %v77_v22, 0.0 }
  0x9d   :  { %v83_v25 = vadd.f32 %v82_v24, %v80_v23 }
  0x9f   :  { %v84_v26 = vrot.slane %v83_v25, 4 }
  0xa1   :  { %v85_v27 = vadd.f32 %v84_v26, %v83_v25 }
  0xa3   :  { %v86_v28 = vrot.slane %v85_v27, 2 }
  0xa5   :  { %v87_v29 = vadd.f32 %v86_v28, %v85_v27  ;;  %v197_v27 = vlaneseq }
  0xa7   :  { %v88_v30 = vrot.slane %v87_v29, 1 }
  0xa9   :  { %v89_v31 = vadd.f32 %v88_v30, %v87_v29  ;;  %v198_v29 = vshrl.u32 %v197_v27, 7 }
  0xab   :  { %v92_v32 = vsel %vm91_vm1, %v89_v31, 0.0  ;;  %v107_v33 = vmul.f32 %v89_v31, %v89_v31  ;;  %v199_v31 = vsub.s32 0, %v198_v29 }
  0xac   :  { %93 = vadd.xlane.f32.xlu1 %v92_v32 }
  0xad   :  { %v108_v34 = vsel %vm91_vm1, %v107_v33, 0.0 }
  0xae   :  { %109 = vadd.xlane.f32.xlu0 %v108_v34 }
  0xbd   :  { %152 = vperm.xlu1 %255, %v44_v4   ;;  %v136_v4 = vld [vmem:[%s399_s3 + $0x8] sm:$0xff]  ;;  %s244_s3 = sld [smem:[#allocation4 + $0x2]] }
  0xc1   :  { %157 = vperm.xlu1 %255, %v45_v0  }
  0xc4   :  { %147 = vperm.xlu0 %254, %v43_v1  }
  0xc5   :  { %167 = vperm.xlu1 %255, %v144_v35  }
  0xc8   :  { %162 = vperm.xlu0 %254, %v46_v3  }
 0x139   :  { %v94_v37 = vpop.xlane.xlu1 %93 }
 0x13a   :  { %v95_v38 = vrot.slane %v94_v37, 4 }
 0x13b   :  { %v110_v39 = vpop.xlane.xlu0 %109 }
 0x13c   :  { %v96_v40 = vadd.f32 %v95_v38, %v94_v37  ;;  %v111_v41 = vrot.slane %v110_v39, 4 }
 0x13d   :  { %v153_v1 = vpop.permute.xlu1 %152 }
 0x13e   :  { %v97_v42 = vrot.slane %v96_v40, 2  ;;  %v112_v43 = vadd.f32 %v111_v41, %v110_v39  ;;  %v171_v6 = vmul.f32 %v153_v1, %v136_v4  ;;  %v212_v39 = vstv %s132_s24 }
 0x13f   :  { %v214_v41 = vstv %s243_s25 }
 0x140   :  { %v113_v44 = vrot.slane %v112_v43, 2  ;;  %v98_v45 = vadd.f32 %v97_v42, %v96_v40  ;;  %v177_v12 = vsel %vm175_vm3, %v171_v6, 0.0 }
 0x141   :  { %v158_v8 = vpop.permute.xlu1 %157 }
 0x142   :  { %v99_v46 = vrot.slane %v98_v45, 1  ;;  %v114_v47 = vadd.f32 %v113_v44, %v112_v43  ;;  %v172_v13 = vmul.f32 %v158_v8, %v137_v7  ;;  %v217_v44 = vstv %s244_s3 }
 0x143   :  { %v148_v3 = vpop.permute.xlu0 %147 }
 0x144   :  { %v100_v48 = vadd.f32 %v99_v46, %v98_v45  ;;  %v115_v49 = vrot.slane %v114_v47, 1  ;;  %v170_v5 = vmul.f32 %v148_v3, %v135_v2  ;;  %v179_v16 = vsel %vm175_vm3, %v172_v13, 0.0 }
 0x145   :  { %v168_v18 = vpop.permute.xlu1 %167 }
 0x146   :  { %246 = vpush %v100_v48  ;;  %v116_v50 = vadd.f32 %v115_v49, %v114_v47  ;;  %v176_v9 = vsel %vm175_vm3, %v170_v5, 0.0  ;;  %v174_v21 = vmul.f32 %v168_v18, %v139_v17 }
 0x147   :  { %v163_v11 = vpop.permute.xlu0 %162  ;;  %v178_v14 = vadd.f32 %v177_v12, %v176_v9 }
 0x148   :  { %248 = vpush %v116_v50  ;;  %v173_v15 = vmul.f32 %v163_v11, %v138_v10  ;;  %v184_v23 = vsel %vm183_vm4, %v174_v21, 0.0 }
 0x149   :  { %v180_v19 = vadd.f32 %v179_v16, %v178_v14 }
 0x14a   :  { %v181_v20 = vsel %vm175_vm3, %v173_v15, 0.0 }
 0x14b   :  { %v182_v22 = vadd.f32 %v181_v20, %v180_v19 }
 0x14d   :  { %v185_v24 = vadd.f32 %v184_v23, %v182_v22 }
 0x14f   :  { %v186_v25 = vrot.slane %v185_v24, 4 }
 0x151   :  { %v187_v26 = vadd.f32 %v186_v25, %v185_v24 }
 0x153   :  { %v188_v28 = vrot.slane %v187_v26, 2 }
 0x155   :  { %v189_v30 = vadd.f32 %v188_v28, %v187_v26 }
 0x157   :  { %v190_v33 = vrot.slane %v189_v30, 1 }
 0x159   :  { %v191_v35 = vadd.f32 %v190_v33, %v189_v30 }
 0x177   :  { %s247_s1 = spop %246 }
 0x178   :  { %v102_v52 = vstv %s247_s1 }
 0x179   :  { %v103_v54 = vadd.f32 %v102_v52, %v90_v51  ;;  %s249_s14 = spop %248 }
 0x17a   :  { %v118_v55 = vstv %s249_s14 }
 0x17b   :  { %105 = vst.msk [vmem:[#allocation2] sm:$0x1] %vm35_vm2, %v103_v54  ;;  %v119_v56 = vadd.f32 %v118_v55, %v106_v53 }
 0x17d   :  { %120 = vst.msk [vmem:[#allocation3] sm:$0x1] %vm35_vm2, %v119_v56 }
 0x182   :  { %v124_v57 = vld [vmem:[#allocation2] sm:$0x1] }
 0x183   :  { %v125_v58 = vmul.f32 0.02, %v124_v57 }
 0x184   :  { %v126_v59 = vld [vmem:[#allocation3] sm:$0x1] }
 0x185   :  { %v127_v60 = vmul.f32 0.02, %v126_v59  ;;  %194 = vperm.xlu0 %254, %v125_v58   ;;  %v128_v61 = vmul.f32 %v125_v58, %v125_v58 }
 0x187   :  { %v129_v62 = vsub.f32 %v127_v60, %v128_v61 }
 0x189   :  { %v130_v63 = vadd.f32 1e-05, %v129_v62 }
 0x18b   :  { %256 = vrsqrt.f32 %v130_v63 }
 0x195   :  { %v257_v0 = vpop.eup %256 }
 0x196   :  { %204 = vperm.xlu1 %255, %v257_v0  }
 0x204   :  { %v195_v32 = vpop.permute.xlu0 %194 }
 0x205   :  { %v200_v34 = vrot.slane %v195_v32, %v199_v31 }
 0x207   :  { %v201_v37 = vsub.f32 %v191_v35, %v200_v34 }
 0x215   :  { %v205_v36 = vpop.permute.xlu1 %204 }
 0x216   :  { %v210_v38 = vrot.slane %v205_v36, %v199_v31 }
 0x218   :  { %v211_v40 = vmul.f32 %v210_v38, %v201_v37 }
 0x21a   :  { %v213_v42 = vmul.f32 %v212_v39, %v211_v40 }
 0x21c   :  { %v215_v43 = vadd.f32 %v214_v41, %v213_v42 }
 0x21e   :  { %v216_v45 = vmax.f32 %v215_v43, 0.0 }
 0x220   :  { %v218_v46 = vmul.f32 %v217_v44, %v216_v45 }
 0x222   :  { %v245_v47 = vmul.f32 -1.442695, %v218_v46 }
 0x224   :  { %258 = vpow2.f32 %v245_v47 }
 0x22e   :  { %v259_v48 = vpop.eup %258 }
 0x22f   :  { %v222_v49 = vadd.f32 1.0, %v259_v48 }
 0x231   :  { %260 = vrcp.f32 %v222_v49 }
 0x23b   :  { %v261_v50 = vpop.eup %260 }
 0x23c   :  { %v225_v51 = vmul.f32 %v261_v50, %v217_v44 }
 0x23e   :  { %227 = vst.msk [vmem:[#allocation7] sm:$0x1] %vm226_vm5, %v225_v51 }
 0x23f   :  { %285 = shalt.err (!%p282_p9)
}
 0x240   :  { %s286_s6 = scalar_lea.hbm %s400_s4, 16 }
 0x241   :  { %p287_p10 = scmp.ne.s32.totalorder %s400_s4, %s286_s6  ;;  %p290_p11 = scmp.lt.u32.totalorder %s286_s6, %s400_s4 }
 0x243   :  { %p292_p12 = pnand %p290_p11, %p287_p10 }
 0x245   :  { %295 = shalt.err (!%p292_p12)
}
 0x246   :  { %237 = dma.vmem_to_hbm [thread:$0]  %s235_s27, 16, %s400_s4, [#allocation5]  }
 0x247   :  { %298 = dma.done.wait [#allocation5], 16  }
 0x248   :  { %299 = vsyncadd [#allocation5], 4294967280 }
 0x249   :  { %241 = vsyncpa [#allocation5], 1 }
 0x24a   :  { %242 = vsyncpa [#allocation6], 1 }

</bundles_post_ra>
